<compile_context>
chip_gen: v7x
topology: tpu7x:2x2x1
jax: 0.10.0
libtpu: 0.0.40
codegen_flags: <defaults>
</compile_context>

<pallas_src>
import functools

import jax
import jax.numpy as jnp
from jax.experimental import pallas as pl
from jax.experimental.pallas import tpu as pltpu

_LANES = 128
_SUBLANES = 8
# 4096 rows * 128 lanes * 4 B = 2 MiB per input block; with 2 inputs double
# buffered that's ~8 MiB of VMEM — fits v5e's 16 MiB scoped default and leaves
# ample headroom on v7x's 64 MiB physical VMEM.
_MAX_TILE_ROWS = 4096


def _round_up(x, m):
    return ((x + m - 1) // m) * m


def _docunet_partial_kernel(y_ref, l_ref, acc_ref, *, tile_rows):
    """Accumulate per-sample partials [sum|d|, sum d, sum d*d] as (8,128) tiles.

    y_ref / l_ref : (1, tile_rows, 128) block of the flattened sample.
    acc_ref       : (1, 3, 8, 128) output block, resident across the chunk
                    (reduction) grid axis — used directly as the accumulator.
    """
    c = pl.program_id(1)

    @pl.when(c == 0)
    def _():
        acc_ref[...] = jnp.zeros_like(acc_ref)

    d = y_ref[0].astype(jnp.float32) - l_ref[0].astype(jnp.float32)
    # Split the sublane axis along (8,128) tile boundaries; summing over the
    # leading axis is pure element-wise VPU adds (no cross-lane/XLU work).
    d3 = d.reshape(tile_rows // _SUBLANES, _SUBLANES, _LANES)

    acc_ref[0, 0] = acc_ref[0, 0] + jnp.sum(jnp.abs(d3), axis=0)
    acc_ref[0, 1] = acc_ref[0, 1] + jnp.sum(d3, axis=0)
    acc_ref[0, 2] = acc_ref[0, 2] + jnp.sum(d3 * d3, axis=0)


def docunet_loss(y, label, *, r=0.1, reduction="mean"):
    assert reduction in ("mean", "sum")
    assert y.shape == label.shape and y.ndim == 4
    bs, n, h, w = y.shape
    per_sample_elems = n * h * w

    # Lane-dense layout: flatten each sample, zero-pad so it reshapes cleanly
    # to (padded_rows, 128) with padded_rows a multiple of the tile size.
    rows = pl.cdiv(per_sample_elems, _LANES)
    tile_rows = min(_round_up(rows, _SUBLANES), _MAX_TILE_ROWS)
    padded_rows = _round_up(rows, tile_rows)
    padded_elems = padded_rows * _LANES
    num_chunks = padded_rows // tile_rows

    def _prep(x):
        x = x.reshape(bs, per_sample_elems)
        if padded_elems != per_sample_elems:
            x = jnp.pad(x, ((0, 0), (0, padded_elems - per_sample_elems)))
        return x.reshape(bs, padded_rows, _LANES)

    y_r = _prep(y)
    l_r = _prep(label)

    kernel = functools.partial(_docunet_partial_kernel, tile_rows=tile_rows)

    itemsize = jnp.dtype(y.dtype).itemsize
    cost = pl.CostEstimate(
        flops=6 * bs * padded_elems,
        transcendentals=0,
        bytes_accessed=2 * bs * padded_elems * itemsize
        + bs * 3 * _SUBLANES * _LANES * 4,
    )

    partials = pl.pallas_call(
        kernel,
        out_shape=jax.ShapeDtypeStruct((bs, 3, _SUBLANES, _LANES), jnp.float32),
        grid_spec=pltpu.PrefetchScalarGridSpec(
            num_scalar_prefetch=0,
            grid=(bs, num_chunks),
            in_specs=[
                pl.BlockSpec((1, tile_rows, _LANES), lambda b, c: (b, c, 0)),
                pl.BlockSpec((1, tile_rows, _LANES), lambda b, c: (b, c, 0)),
            ],
            out_specs=pl.BlockSpec(
                (1, 3, _SUBLANES, _LANES), lambda b, c: (b, 0, 0, 0)),
        ),
        compiler_params=pltpu.CompilerParams(
            dimension_semantics=("parallel", "arbitrary"),
            vmem_limit_bytes=32 * 1024 * 1024,
        ),
        cost_estimate=cost,
    )(y_r, l_r)

    # Final cross-lane reduction + loss combine (tiny) done in JAX so the
    # kernel's batch axis can be sharded across TensorCores.
    sums = partials.sum(axis=(2, 3))  # (bs, 3): [sum|d|, sum d, sum d^2]
    inv_n = 1.0 / float(per_sample_elems)
    loss1_i = sums[:, 0] * inv_n - float(r) * jnp.abs(sums[:, 1] * inv_n)
    sum_sq_total = sums[:, 2].sum()
    if reduction == "mean":
        loss1 = loss1_i.mean()
        loss2 = sum_sq_total / float(bs * per_sample_elems)
    else:  # 'sum'
        loss1 = loss1_i.sum()
        loss2 = sum_sq_total
    return loss1 + loss2


def _reference_loss(y, label, r=0.1, reduction="mean"):
    y = y.astype(jnp.float32)
    label = label.astype(jnp.float32)
    d = y - label
    loss1 = jnp.abs(d).mean(axis=(1, 2, 3)) - r * jnp.abs(d.mean(axis=(1, 2, 3)))
    if reduction == "mean":
        loss1 = loss1.mean()
        loss2 = jnp.mean(d * d)
    else:
        loss1 = loss1.sum()
        loss2 = jnp.sum(d * d)
    return loss1 + loss2


if __name__ == "__main__":
    key = jax.random.PRNGKey(0)
    k1, k2 = jax.random.split(key)
    bs, n, h, w = 2, 4, 16, 16
    y = jax.random.normal(k1, (bs, n, h, w), dtype=jnp.float32)
    label = jax.random.normal(k2, (bs, n, h, w), dtype=jnp.float32)

    out = docunet_loss(y, label, r=0.1, reduction="mean")
    out = jax.block_until_ready(out)
    ref = _reference_loss(y, label, r=0.1, reduction="mean")
    assert jnp.allclose(out, ref, rtol=1e-5, atol=1e-5), (out, ref)

    # Exercise the zero-padding path (n*h*w not a multiple of 128) and 'sum'.
    y2 = jax.random.normal(k1, (2, 3, 10, 10), dtype=jnp.float32)
    l2 = jax.random.normal(k2, (2, 3, 10, 10), dtype=jnp.float32)
    out2 = jax.block_until_ready(docunet_loss(y2, l2, r=0.1, reduction="sum"))
    ref2 = _reference_loss(y2, l2, r=0.1, reduction="sum")
    assert jnp.allclose(out2, ref2, rtol=1e-5, atol=1e-5), (out2, ref2)

    print("KERNEL_OK")
</pallas_src>

<mosaic_0001>
module attributes {stable_mosaic.version = 11 : i64} {
  func.func @_docunet_partial_kernel(%arg0: i32, %arg1: i32, %arg2: memref<1x8x128xf32, #tpu.memory_space<vmem>>, %arg3: memref<1x8x128xf32, #tpu.memory_space<vmem>>, %arg4: memref<1x3x8x128xf32, #tpu.memory_space<vmem>>) attributes {dimension_semantics = [#tpu.dimension_semantics<parallel>, #tpu.dimension_semantics<arbitrary>], iteration_bounds = array<i64: 2, 1>, scalar_prefetch = 0 : i64, scratch_operands = 0 : i64, tpu.core_type = #tpu.core_type<tc>, window_params = [{transform_indices = @transform_0, window_bounds = array<i64: 1, 8, 128>}, {transform_indices = @transform_1, window_bounds = array<i64: 1, 8, 128>}, {transform_indices = @transform_2, window_bounds = array<i64: 1, 3, 8, 128>}]} {
    %c0_i32 = arith.constant 0 : i32
    %0 = arith.cmpi eq, %arg1, %c0_i32 : i32
    %1 = arith.extui %0 : i1 to i32
    %c0_i32_0 = arith.constant 0 : i32
    %2 = arith.cmpi ne, %1, %c0_i32_0 : i32
    scf.if %2 {
      %cst_30 = arith.constant 0.000000e+00 : f32
      %32 = vector.broadcast %cst_30 : f32 to vector<1x3x8x128xf32>
      %c0_31 = arith.constant 0 : index
      %c0_32 = arith.constant 0 : index
      %c0_33 = arith.constant 0 : index
      %c0_34 = arith.constant 0 : index
      %33 = vector.load %arg4[%c0_31, %c0_32, %c0_33, %c0_34] : memref<1x3x8x128xf32, #tpu.memory_space<vmem>>, vector<1x3x8x128xf32>
      tpu.vector_store %arg4[%c0_31, %c0_32, %c0_33, %c0_34], %32 {strides = array<i32>} : memref<1x3x8x128xf32, #tpu.memory_space<vmem>>, vector<1x3x8x128xf32>,
    } else {
    }
    %c0 = arith.constant 0 : index
    %c0_1 = arith.constant 0 : index
    %c0_2 = arith.constant 0 : index
    %3 = vector.load %arg2[%c0, %c0_1, %c0_2] : memref<1x8x128xf32, #tpu.memory_space<vmem>>, vector<1x8x128xf32>
    %4 = vector.shape_cast %3 : vector<1x8x128xf32> to vector<8x128xf32>
    %c0_3 = arith.constant 0 : index
    %c0_4 = arith.constant 0 : index
    %c0_5 = arith.constant 0 : index
    %5 = vector.load %arg3[%c0_3, %c0_4, %c0_5] : memref<1x8x128xf32, #tpu.memory_space<vmem>>, vector<1x8x128xf32>
    %6 = vector.shape_cast %5 : vector<1x8x128xf32> to vector<8x128xf32>
    %7 = arith.subf %4, %6 : vector<8x128xf32>
    %8 = vector.shape_cast %7 : vector<8x128xf32> to vector<1x8x128xf32>
    %c0_6 = arith.constant 0 : index
    %c0_7 = arith.constant 0 : index
    %c0_8 = arith.constant 0 : index
    %c0_9 = arith.constant 0 : index
    %9 = vector.load %arg4[%c0_6, %c0_7, %c0_8, %c0_9] : memref<1x3x8x128xf32, #tpu.memory_space<vmem>>, vector<1x1x8x128xf32>
    %10 = vector.shape_cast %9 : vector<1x1x8x128xf32> to vector<8x128xf32>
    %11 = math.absf %8 : vector<1x8x128xf32>
    %cst = arith.constant dense<0.000000e+00> : vector<8x128xf32>
    %12 = vector.multi_reduction <add>, %11, %cst [0] : vector<1x8x128xf32> to vector<8x128xf32>
    %13 = arith.addf %10, %12 : vector<8x128xf32>
    %c0_10 = arith.constant 0 : index
    %c0_11 = arith.constant 0 : index
    %c0_12 = arith.constant 0 : index
    %c0_13 = arith.constant 0 : index
    %14 = vector.load %arg4[%c0_10, %c0_11, %c0_12, %c0_13] : memref<1x3x8x128xf32, #tpu.memory_space<vmem>>, vector<1x1x8x128xf32>
    %15 = vector.shape_cast %14 : vector<1x1x8x128xf32> to vector<8x128xf32>
    %16 = vector.shape_cast %13 : vector<8x128xf32> to vector<1x1x8x128xf32>
    tpu.vector_store %arg4[%c0_10, %c0_11, %c0_12, %c0_13], %16 {strides = array<i32>} : memref<1x3x8x128xf32, #tpu.memory_space<vmem>>, vector<1x1x8x128xf32>,
    %c0_14 = arith.constant 0 : index
    %c1 = arith.constant 1 : index
    %c0_15 = arith.constant 0 : index
    %c0_16 = arith.constant 0 : index
    %17 = vector.load %arg4[%c0_14, %c1, %c0_15, %c0_16] : memref<1x3x8x128xf32, #tpu.memory_space<vmem>>, vector<1x1x8x128xf32>
    %18 = vector.shape_cast %17 : vector<1x1x8x128xf32> to vector<8x128xf32>
    %cst_17 = arith.constant dense<0.000000e+00> : vector<8x128xf32>
    %19 = vector.multi_reduction <add>, %8, %cst_17 [0] : vector<1x8x128xf32> to vector<8x128xf32>
    %20 = arith.addf %18, %19 : vector<8x128xf32>
    %c0_18 = arith.constant 0 : index
    %c1_19 = arith.constant 1 : index
    %c0_20 = arith.constant 0 : index
    %c0_21 = arith.constant 0 : index
    %21 = vector.load %arg4[%c0_18, %c1_19, %c0_20, %c0_21] : memref<1x3x8x128xf32, #tpu.memory_space<vmem>>, vector<1x1x8x128xf32>
    %22 = vector.shape_cast %21 : vector<1x1x8x128xf32> to vector<8x128xf32>
    %23 = vector.shape_cast %20 : vector<8x128xf32> to vector<1x1x8x128xf32>
    tpu.vector_store %arg4[%c0_18, %c1_19, %c0_20, %c0_21], %23 {strides = array<i32>} : memref<1x3x8x128xf32, #tpu.memory_space<vmem>>, vector<1x1x8x128xf32>,
    %c0_22 = arith.constant 0 : index
    %c2 = arith.constant 2 : index
    %c0_23 = arith.constant 0 : index
    %c0_24 = arith.constant 0 : index
    %24 = vector.load %arg4[%c0_22, %c2, %c0_23, %c0_24] : memref<1x3x8x128xf32, #tpu.memory_space<vmem>>, vector<1x1x8x128xf32>
    %25 = vector.shape_cast %24 : vector<1x1x8x128xf32> to vector<8x128xf32>
    %26 = arith.mulf %8, %8 : vector<1x8x128xf32>
    %cst_25 = arith.constant dense<0.000000e+00> : vector<8x128xf32>
    %27 = vector.multi_reduction <add>, %26, %cst_25 [0] : vector<1x8x128xf32> to vector<8x128xf32>
    %28 = arith.addf %25, %27 : vector<8x128xf32>
    %c0_26 = arith.constant 0 : index
    %c2_27 = arith.constant 2 : index
    %c0_28 = arith.constant 0 : index
    %c0_29 = arith.constant 0 : index
    %29 = vector.load %arg4[%c0_26, %c2_27, %c0_28, %c0_29] : memref<1x3x8x128xf32, #tpu.memory_space<vmem>>, vector<1x1x8x128xf32>
    %30 = vector.shape_cast %29 : vector<1x1x8x128xf32> to vector<8x128xf32>
    %31 = vector.shape_cast %28 : vector<8x128xf32> to vector<1x1x8x128xf32>
    tpu.vector_store %arg4[%c0_26, %c2_27, %c0_28, %c0_29], %31 {strides = array<i32>} : memref<1x3x8x128xf32, #tpu.memory_space<vmem>>, vector<1x1x8x128xf32>,
    return
  }
  func.func @transform_0(%arg0: i32, %arg1: i32) -> (i32, i32, i32) {
    %c0_i32 = arith.constant 0 : i32
    %c0_i32_0 = arith.constant 0 : i32
    return %arg0, %arg1, %c0_i32 : i32, i32, i32
  }
  func.func @transform_1(%arg0: i32, %arg1: i32) -> (i32, i32, i32) {
    %c0_i32 = arith.constant 0 : i32
    %c0_i32_0 = arith.constant 0 : i32
    return %arg0, %arg1, %c0_i32 : i32, i32, i32
  }
  func.func @transform_2(%arg0: i32, %arg1: i32) -> (i32, i32, i32, i32) {
    %c0_i32 = arith.constant 0 : i32
    %c0_i32_0 = arith.constant 0 : i32
    %c0_i32_1 = arith.constant 0 : i32
    %c0_i32_2 = arith.constant 0 : i32
    return %arg0, %c0_i32, %c0_i32_0, %c0_i32_1 : i32, i32, i32, i32
  }
}

</mosaic_0001>

<bundles_post_ra>
// kernel: tpu_custom_call.1
= control target key start
LH: loop header
LB: loop body
LE: loop exit
PB: predicated region body
PF: predicated region fallthrough
CT: control target
= control target key end

     0   :  { %7 = vsyncpa [#allocation3], 0  ;;  %s841_s0 = inlined_call_operand.hbm [shape: f32[2,8,128], index: 0, kind: input, shape index: {}]   ;;  %s842_s1 = inlined_call_operand.hbm [shape: f32[2,8,128], index: 1, kind: input, shape index: {}]   ;;  %s843_s2 = inlined_call_operand.hbm [shape: f32[2,3,8,128], index: 2, kind: output, shape index: {}]  }
   0x1   :  { %9 = vsyncpa [#allocation3 + $0x1], 0 }
   0x2   :  { %10 = vsyncpa [#allocation6], 0 }
   0x3   :  { %12 = vsyncpa [#allocation6 + $0x1], 0 }
   0x4   :  { %13 = vsyncpa [#allocation4], 0 }
   0x5   :  { %15 = vsyncpa [#allocation4 + $0x1], 0  ;;  %s618_s9 = smov 0   ;;  %s620_s10 = smov 0  }
   0x6   :  { %s622_s11 = smov 0   ;;  %s624_s12 = smov 0  }
   0x7   :  { %s626_s13 = smov 0   ;;  %s628_s14 = smov 0  }
   0x8 LB: > { %s360_s15 = sadd.s32 4294967295, %s596_s14   ;;  %s361_s16 = sadd.s32 4294967294, %s596_s14   ;;  %s596_s14 = sphi %s628_s14, %s21_s14   ;;  %s592_s13 = sphi %s626_s13, %s863_s13   ;;  %s588_s12 = sphi %s624_s12, %s862_s12   ;;  %s584_s11 = sphi %s622_s11, %s861_s11   ;;  %s580_s10 = sphi %s620_s10, %s860_s10   ;;  %s576_s9 = sphi %s618_s9, %s859_s9  }
   0x9   : > { %s33_s17 = sadd.s32 1, %s592_s13  ;;  %s42_s18 = sadd.s32 1, %s584_s11 }
   0xa   : > { %p35_p0 = scmp.ge.s32.totalorder %s33_s17, 2  ;;  %p49_p1 = scmp.ne.s32.totalorder %s584_s11, %s580_s10 }
   0xb   : > { %p50_p2 = scmp.eq.s32.totalorder %s596_s14, 0  ;;  %p55_p3 = scmp.ne.s32.totalorder %s580_s10, %s576_s9 }
   0xc   : > { %s865_s17 = smov (%p35_p0, %s33_s17), 0  ;;  %p56_p5 = scmp.eq.s32.totalorder %s360_s15, 0 }
   0xd   : > { %p659_p4 = por %p50_p2, %p49_p1  ;;  %s37_s20 = ssub.s32 %s592_s13, %s865_s17 }
   0xe   : > { %p107_p6 = scmp.eq.s32.totalorder %s360_s15, 1  ;;  %p40_p7 = scmp.eq.s32.totalorder %s37_s20, 0 }
   0xf   : > { %p665_p8 = por %p56_p5, %p55_p3  ;;  %p113_p10 = scmp.eq.s32.totalorder %s361_s16, 1 }
  0x10   : > { %p669_p9 = por %p107_p6, %p49_p1  ;;  %p397_p13 = scmp.lt.s32.totalorder %s596_s14, 2 }
  0x11   : > { %s847_s21 = scalar_select %p665_p8, 1, 0 }
  0x12   : > { %s848_s22 = scalar_select %p669_p9, 1, 0 }
  0x13   : > { %s674_s23 = scalar_select %p40_p7, %s584_s11, %s42_s18  }
  0x14   : > { %p676_p11 = por %p113_p10, %p55_p3  ;;  %s683_s25 = sand.u32 1, %s584_s11  }
  0x15   : > { %s364_s26 = sshll.u32 %s683_s25, 3  ;;  %s365_s27 = sshll.u32 %s592_s13, 7 }
  0x16   : > { %s849_s24 = scalar_select %p676_p11, 1, 0 }
  0x17   : > { %s692_s30 = scalar_lea.hbm %s841_s0, %s365_s27  ;;  %s137_s3 = scalar_lea.vmem [#allocation2], %s364_s26 }
  0x18   : > { %s145_s4 = sshll.u32 %s137_s3, 4  ;;  %p700_p0 = pnand %p397_p13, %p659_p4  ;;  %s696_s4 = int_to_ptr.vmem [resolvable:$true] %s145_s4 }
  0x19   : > { %s134_s6 = scalar_lea.sflag [#allocation3], %s683_s25  ;;  %s450_s7 = scalar_lea.hbm %s692_s30, 128 }
  0x1a   : > { %p451_p3 = scmp.ne.s32.totalorder %s692_s30, %s450_s7  ;;  %p452_p5 = pneg %p700_p0 }
  0x1b   : > { %s455_s16 = scalar_lea.hbm %s841_s0, 256  ;;  %p456_p4 = scmp.lt.u32.totalorder %s692_s30, %s841_s0 }
  0x1c   : > { %p453_p6 = pnand %p452_p5, %p451_p3  ;;  %p457_p10 = scmp.lt.u32.totalorder %s455_s16, %s450_s7 }
  0x1d   : > { %p459_p12 = scmp.lt.u32.totalorder %s450_s7, %s692_s30 }
  0x1e   : > { %p454_p7 = pneg %p453_p6  ;;  %p458_p13 = por %p457_p10, %p456_p4 }
  0x20   : > { %p460_p1 = por %p459_p12, %p458_p13 }
  0x22   : > { %p461_p2 = pnand %p460_p1, %p454_p7 }
  0x24   : > { %464 = shalt.err (!%p461_p2)
}
  0x25   : > { %s465_s20 = scalar_lea.vmem %s696_s4, 128  ;;  %s598_s28 = smov [#allocation2]  }
  0x26   : > { %p466_p3 = scmp.ne.s32.totalorder %s696_s4, %s465_s20  ;;  %s470_s29 = sshll.u32 %s598_s28, 4  ;;  %s471_s29 = int_to_ptr.vmem [resolvable:$false] %s470_s29 }
  0x27   : > { %s472_s3 = scalar_lea.vmem %s471_s29, 256  ;;  %p473_p9 = scmp.lt.s32.totalorder %s696_s4, %s471_s29 }
  0x28   : > { %p468_p6 = pnand %p466_p3, %p452_p5  ;;  %p474_p4 = scmp.lt.s32.totalorder %s472_s3, %s465_s20 }
  0x2a   : > { %p469_p11 = pneg %p468_p6  ;;  %p475_p10 = por %p474_p4, %p473_p9 }
  0x2c   : > { %p476_p12 = pnand %p475_p10, %p469_p11 }
  0x2e   : > { %479 = shalt.err (!%p476_p12)
}
  0x2f   : > { %389 = dma.hbm_to_vmem [thread:$0]  (!%p700_p0), %s692_s30, 128, %s696_s4, %s134_s6  }
  0x30   : > { %p851_p1 = scmp.lt.s32.totalorder %s596_s14, 3  ;;  %p852_p2 = scmp.ge.s32.totalorder %s596_s14, 1 }
  0x31   : > { %s745_s16 = scalar_lea.hbm %s842_s1, %s365_s27  ;;  %s156_s18 = scalar_lea.vmem [#allocation5], %s364_s26 }
  0x32   : > { %p736_p7 = pnand %p852_p2, %p851_p1  ;;  %s164_s19 = sshll.u32 %s156_s18, 4  ;;  %s165_s19 = int_to_ptr.vmem [resolvable:$true] %s164_s19 }
  0x33   : > { %s153_s30 = scalar_lea.sflag [#allocation6], %s683_s25  ;;  %s480_s4 = scalar_lea.hbm %s745_s16, 128 }
  0x34   : > { %s853_s7 = scalar_select %p736_p7, 1, 0 }
  0x35   : > { %p481_p9 = scmp.ne.s32.totalorder %s745_s16, %s480_s4  ;;  %s485_s27 = scalar_lea.hbm %s842_s1, 256 }
  0x36   : > { %p486_p3 = scmp.lt.u32.totalorder %s745_s16, %s842_s1  ;;  %p487_p6 = scmp.lt.u32.totalorder %s485_s27, %s480_s4 }
  0x37   : > { %p483_p11 = pnand %p481_p9, %p452_p5  ;;  %p489_p10 = scmp.lt.u32.totalorder %s480_s4, %s745_s16 }
  0x38   : > { %p488_p4 = por %p487_p6, %p486_p3 }
  0x39   : > { %p484_p13 = pneg %p483_p11 }
  0x3a   : > { %p490_p12 = por %p489_p10, %p488_p4 }
  0x3c   : > { %p491_p1 = pnand %p490_p12, %p484_p13 }
  0x3e   : > { %494 = shalt.err (!%p491_p1)
}
  0x3f   : > { %s495_s25 = scalar_lea.vmem %s165_s19, 128  ;;  %s599_s26 = smov [#allocation5]  }
  0x40   : > { %p496_p2 = scmp.ne.s32.totalorder %s165_s19, %s495_s25  ;;  %s500_s3 = sshll.u32 %s599_s26, 4  ;;  %s501_s3 = int_to_ptr.vmem [resolvable:$false] %s500_s3 }
  0x41   : > { %s502_s8 = scalar_lea.vmem %s501_s3, 256  ;;  %p503_p8 = scmp.lt.s32.totalorder %s165_s19, %s501_s3 }
  0x42   : > { %p498_p9 = pnand %p496_p2, %p452_p5  ;;  %p504_p7 = scmp.lt.s32.totalorder %s502_s8, %s495_s25 }
  0x44   : > { %p499_p11 = pneg %p498_p9  ;;  %p505_p3 = por %p504_p7, %p503_p8 }
  0x46   : > { %p506_p6 = pnand %p505_p3, %p499_p11 }
  0x48   : > { %509 = shalt.err (!%p506_p6)
}
  0x49   : > { %392 = dma.hbm_to_vmem [thread:$0]  (!%p700_p0), %s745_s16, 128, %s165_s19, %s153_s30  }
  0x4a   : > { %p854_p13 = scmp.ne.s32.totalorder %s853_s7, 0 }
  0x4b   : > { %s772_s15 = sand.u32 (!%p854_p13), 1, %s580_s10   ;;  %p855_p5 = scmp.ne.s32.totalorder (!%p854_p13), %s847_s21, 0 }
  0x4c   : > { %173 = sbr.rel (%p854_p13) target bundleno = 113 (0x71), region = 28  ;;  %s369_s18 = sshll.u32 (!%p854_p13), %s772_s15, 3 }
  0x4d   : > { %s176_s4 = scalar_lea.sflag (!%p854_p13), [#allocation3], %s772_s15  ;;  %s179_s6 = scalar_lea.vmem (!%p854_p13), [#allocation2], %s369_s18 }
  0x53   : > { %563 = dma.done.wait (%p855_p5), %s176_s4, 128  }
  0x54   : > { %565 = vsyncadd (%p855_p5), %s176_s4, 4294967168  ;;  %s185_s5 = scalar_lea.sflag [#allocation6], %s772_s15  ;;  %s188_s16 = scalar_lea.vmem [#allocation5], %s369_s18 }
  0x55   : > { %567 = dma.done.wait (%p855_p5), %s185_s5, 128  }
  0x56   : > { %569 = vsyncadd (%p855_p5), %s185_s5, 4294967168  ;;  %s378_s7 = smul.u32 24, %s772_s15  ;;  %v221_v0 = vld [vmem:[%s179_s6] sm:$0xff]  ;;  %v222_v1 = vld [vmem:[%s188_s16] sm:$0xff]  ;;  %s241_s21 = scalar_lea.sflag [#allocation4], %s772_s15 }
  0x57   : > { %v223_v2 = vsub.f32 %v221_v0, %v222_v1  ;;  %s379_s19 = smul.u32 384, %s588_s12  ;;  %p856_p0 = scmp.ne.s32.totalorder %s848_s22, 0 }
  0x58   : > { %s213_s30 = scalar_lea.vmem [#allocation7], %s378_s7  ;;  %s600_s12 = smov [#allocation7]  }
  0x59   : > { %s254_s20 = sshll.u32 %s213_s30, 4  ;;  %v225_v3 = vand.u32 2147483647, %v223_v2  ;;  %v236_v4 = vmul.f32 %v223_v2, %v223_v2  ;;  %372 = vst [vmem:[%s213_s30 + $0x8] sm:$0xff] %v223_v2  ;;  %s790_s29 = scalar_lea.hbm %s843_s2, %s379_s19  ;;  %s792_s20 = int_to_ptr.vmem [resolvable:$true] %s254_s20 }
  0x5a   : > { %s510_s25 = scalar_lea.vmem %s792_s20, 384  ;;  %s514_s26 = sshll.u32 %s600_s12, 4  ;;  %s515_s26 = int_to_ptr.vmem [resolvable:$false] %s514_s26 }
  0x5b   : > { %228 = vst [vmem:[%s213_s30] sm:$0xff] %v225_v3  ;;  %374 = vst [vmem:[%s213_s30 + $0x10] sm:$0xff] %v236_v4  ;;  %p511_p8 = scmp.ne.s32.totalorder %s792_s20, %s510_s25  ;;  %s516_s3 = scalar_lea.vmem %s515_s26, 768 }
  0x5c   : > { %p517_p10 = scmp.lt.s32.totalorder %s792_s20, %s515_s26  ;;  %p518_p12 = scmp.lt.s32.totalorder %s516_s3, %s510_s25 }
  0x5d   : > { %p512_p7 = pnand %p511_p8, %p856_p0 }
  0x5e   : > { %p519_p1 = por %p518_p12, %p517_p10 }
  0x5f   : > { %p513_p4 = pneg %p512_p7 }
  0x61   : > { %p520_p2 = pnand %p519_p1, %p513_p4 }
  0x63   : > { %523 = shalt.err (!%p520_p2)
}
  0x64   : > { %s524_s8 = scalar_lea.hbm %s790_s29, 384  ;;  %s528_s6 = scalar_lea.hbm %s843_s2, 768 }
  0x65   : > { %p525_p9 = scmp.ne.s32.totalorder %s790_s29, %s524_s8  ;;  %p529_p6 = scmp.lt.u32.totalorder %s790_s29, %s843_s2 }
  0x66   : > { %p530_p13 = scmp.lt.u32.totalorder %s528_s6, %s524_s8  ;;  %p532_p8 = scmp.lt.u32.totalorder %s524_s8, %s790_s29 }
  0x67   : > { %p526_p11 = pnand %p525_p9, %p856_p0 }
  0x68   : > { %p531_p5 = por %p530_p13, %p529_p6 }
  0x69   : > { %p527_p3 = pneg %p526_p11 }
  0x6a   : > { %p533_p7 = por %p532_p8, %p531_p5 }
  0x6c   : > { %p534_p4 = pnand %p533_p7, %p527_p3 }
  0x6e   : > { %537 = shalt.err (!%p534_p4)
}
  0x6f   : > { %s601_s7 = smov 128   ;;  %s602_s19 = smov 8  }
  0x70   : > { %384 = dma.vmem_to_hbm [thread:$0]  (%p856_p0), %s792_s20, 384, %s790_s29, %s241_s21, %s601_s7, %s601_s7, %s602_s19  }
  0x71 PF: > { %s269_s30 = sand.u32 1, %s576_s9   ;;  %p857_p10 = scmp.ne.s32.totalorder %s849_s24, 0 }
  0x72   : > { %p858_p12 = scmp.ge.s32.totalorder %s596_s14, 2  ;;  %s270_s27 = scalar_lea.sflag [#allocation4], %s269_s30 }
  0x74   : > { %p394_p1 = pnand %p858_p12, %p857_p10 }
  0x76   : > { %571 = dma.done.wait (!%p394_p1), %s270_s27, 384  }
  0x77   : > { %573 = vsyncadd (!%p394_p1), %s270_s27, 4294966912  ;;  %s21_s14 = sadd.s32 1, %s596_s14   ;;  %s859_s9 = smov %s580_s10 }
  0x78   : > { %p18_p2 = scmp.ge.s32.totalorder %s21_s14, 4   ;;  %s860_s10 = smov %s584_s11 }
  0x79   : > { %s861_s11 = smov %s674_s23  ;;  %s862_s12 = smov %s592_s13 }
  0x7a   : > { %s863_s13 = smov %s865_s17  ;;  %20 = sbr.rel (!%p18_p2) target bundleno = 8 (0x8), region = 92 }
  0x81   :  { %275 = vsyncpa [#allocation3], 1 }
  0x82   :  { %277 = vsyncpa [#allocation3 + $0x1], 1 }
  0x83   :  { %278 = vsyncpa [#allocation6], 1 }
  0x84   :  { %280 = vsyncpa [#allocation6 + $0x1], 1 }
  0x85   :  { %281 = vsyncpa [#allocation4], 1 }
  0x86   :  { %283 = vsyncpa [#allocation4 + $0x1], 1 }

</bundles_post_ra>
